<compile_context>
chip_gen: v7x
topology: tpu7x:2x2x1
jax: 0.10.0
libtpu: 0.0.40
codegen_flags: <defaults>
</compile_context>

<pallas_src>
import jax
import jax.numpy as jnp
from jax.experimental import pallas as pl
from jax.experimental.pallas import tpu as pltpu


def _round_up(n: int, m: int) -> int:
    return ((n + m - 1) // m) * m


def _cdiv(a: int, b: int) -> int:
    return (a + b - 1) // b


def _head_kernel(x_ref, w1_ref, b1_ref, w2_ref, b2_ref, out_ref):
    # x_ref:  [B_TILE, H]       f32/bf16 (CLS rows for this batch tile)
    # w1_ref: [H, INNER]        bf16     (resident across the grid)
    # b1_ref: [1, INNER]        f32
    # w2_ref: [INNER, C_PAD]    bf16     (resident across the grid)
    # b2_ref: [1, C_PAD]        f32
    # out_ref:[B_TILE, C_PAD]   f32      (lane-dense: C_PAD multiple of 128)

    # TODO(synk): dropout is identity in eval mode; no stochastic mask emitted.
    # TODO(synk): activation_fn is configurable in fairseq; standard RoBERTa
    #             classification heads use tanh, which is hardwired here.

    x = x_ref[...].astype(jnp.bfloat16)

    # dense: [B_TILE, H] @ [H, INNER] -> f32 accum, + bias, tanh (EUP)
    h = jnp.dot(x, w1_ref[...], preferred_element_type=jnp.float32) + b1_ref[...]
    h = jnp.tanh(h)

    # out_proj: [B_TILE, INNER] @ [INNER, C_PAD] -> f32 accum, + bias
    y = (jnp.dot(h.astype(jnp.bfloat16), w2_ref[...],
                 preferred_element_type=jnp.float32) + b2_ref[...])

    out_ref[...] = y.astype(out_ref.dtype)


def prepare_head_params(w1, b1, w2, b2):
    """One-time weight preprocessing, hoisted out of the per-call forward:
    bf16 cast for the MXU and lane-dense padding of the class dim to 128.
    Call once at model load and reuse the returned dict for every forward."""
    H, inner = w1.shape
    C = w2.shape[1]
    c_pad = _round_up(max(C, 128), 128)

    w1b = jnp.asarray(w1, jnp.float32).astype(jnp.bfloat16)            # [H, inner]
    b1r = jnp.asarray(b1, jnp.float32).reshape(1, inner)               # [1, inner]
    w2p = jnp.pad(jnp.asarray(w2, jnp.float32),
                  ((0, 0), (0, c_pad - C))).astype(jnp.bfloat16)       # [inner, c_pad]
    b2p = jnp.pad(jnp.asarray(b2, jnp.float32).reshape(1, C),
                  ((0, 0), (0, c_pad - C)))                            # [1, c_pad]

    return {"w1": w1b, "b1": b1r, "w2": w2p, "b2": b2p, "num_classes": C}


def roberta_classification_head(features, params, *, b_tile=None):
    """features: [B, T, H] (f32 or bf16); params: output of prepare_head_params.
    Returns logits [B, C] f32."""
    B, T, H = features.shape
    w1b, b1r, w2b, b2p = params["w1"], params["b1"], params["w2"], params["b2"]
    C = params["num_classes"]
    inner = w1b.shape[1]
    c_pad = w2b.shape[1]

    # --- CLS-token select folded into the kernel's input BlockSpec ------------
    # View features as [B, T*H] (free reshape: row-major layout is unchanged so
    # XLA lowers it to a bitcast) and let the x BlockSpec's block DMA fetch only
    # columns [0, H) of each row -- exactly features[:, 0, :] -- directly from
    # HBM.  Legal whenever the block's last dim H is a multiple of 128 (always
    # true for real RoBERTa dims) or T == 1; otherwise fall back to a wrapper
    # slice so only the [B, H] CLS matrix reaches the kernel.
    if H % 128 == 0 or T == 1:
        x_in = features.reshape(B, T * H)
    else:
        x_in = features[:, 0, :]

    # --- batch tiling ----------------------------------------------------------
    # Multiple of 8 sublanes; >= 2 tiles when B allows it so v7x's two
    # TensorCores both get work via dimension_semantics=("parallel",); capped at
    # 512 rows so double-buffered tiles fit comfortably in v7x's 64 MiB VMEM.
    # On v5e/v6e (128 MiB VMEM) pass a larger b_tile for very large B.
    if b_tile is None:
        if B < 16:
            b_tile = B                                   # single full-batch tile
        else:
            b_tile = min(512, _round_up(_cdiv(B, 2), 8))

    grid = (pl.cdiv(B, b_tile),)  # ragged last tile handled by Pallas masking

    out_padded = pl.pallas_call(
        _head_kernel,
        out_shape=jax.ShapeDtypeStruct((B, c_pad), jnp.float32),
        grid_spec=pltpu.PrefetchScalarGridSpec(
            num_scalar_prefetch=0,
            grid=grid,
            in_specs=[
                pl.BlockSpec((b_tile, H), lambda i: (i, 0)),      # CLS rows only
                pl.BlockSpec((H, inner), lambda i: (0, 0)),       # w1 resident
                pl.BlockSpec((1, inner), lambda i: (0, 0)),       # b1 resident
                pl.BlockSpec((inner, c_pad), lambda i: (0, 0)),   # w2 resident
                pl.BlockSpec((1, c_pad), lambda i: (0, 0)),       # b2 resident
            ],
            out_specs=pl.BlockSpec((b_tile, c_pad), lambda i: (i, 0)),
        ),
        compiler_params=pltpu.CompilerParams(
            dimension_semantics=("parallel",),   # shard batch tiles across TCs
            vmem_limit_bytes=32 * 1024 * 1024,   # safe on v5e/v6e/v7x; raise if
                                                 # you pass a much larger b_tile
        ),
    )(x_in, w1b, b1r, w2b, b2p)

    return out_padded[:, :C]


if __name__ == "__main__":
    # Small shapes consistent with the module's forward.  H chosen as a
    # multiple of 128 so the in-kernel CLS-select path is exercised.
    B, T, H = 16, 8, 128     # batch, seq len, input_dim
    INNER = 64               # inner_dim
    C = 4                    # num_classes

    key = jax.random.PRNGKey(0)
    k_feat, k_w1, k_b1, k_w2, k_b2 = jax.random.split(key, 5)

    features = jax.random.normal(k_feat, (B, T, H), dtype=jnp.float32)
    # Deterministic parameter init (no checkpoint load).
    w1 = jax.random.normal(k_w1, (H, INNER), dtype=jnp.float32) * 0.02
    b1 = jax.random.normal(k_b1, (1, INNER), dtype=jnp.float32) * 0.02
    w2 = jax.random.normal(k_w2, (INNER, C), dtype=jnp.float32) * 0.02
    b2 = jax.random.normal(k_b2, (1, C), dtype=jnp.float32) * 0.02

    # One-time weight prep (hoisted out of the per-call forward path).
    params = prepare_head_params(w1, b1, w2, b2)

    out = roberta_classification_head(features, params)
    out = jax.block_until_ready(out)

    # Cross-check against a pure-JAX f32 reference of the same forward pass.
    # bf16 matmul inputs (f32 accumulation) => loosened tolerance.
    x_ref = features[:, 0, :]
    ref = jnp.tanh(x_ref @ w1 + b1) @ w2 + b2
    assert out.shape == (B, C)
    assert jnp.allclose(out, ref, atol=1e-2, rtol=1e-2)

    print("KERNEL_OK")
</pallas_src>

<mosaic_0001>
module attributes {stable_mosaic.version = 11 : i64} {
  func.func @_head_kernel(%arg0: i32, %arg1: memref<8x128xf32, #tpu.memory_space<vmem>>, %arg2: memref<128x64xbf16, #tpu.memory_space<vmem>>, %arg3: memref<1x64xf32, #tpu.memory_space<vmem>>, %arg4: memref<64x128xbf16, #tpu.memory_space<vmem>>, %arg5: memref<1x128xf32, #tpu.memory_space<vmem>>, %arg6: memref<8x128xf32, #tpu.memory_space<vmem>>) attributes {dimension_semantics = [#tpu.dimension_semantics<parallel>], iteration_bounds = array<i64: 2>, scalar_prefetch = 0 : i64, scratch_operands = 0 : i64, tpu.core_type = #tpu.core_type<tc>, window_params = [{transform_indices = @transform_0, window_bounds = array<i64: 8, 128>}, {pipeline_mode = #tpu.pipeline_mode<synchronous>, transform_indices = @transform_1, window_bounds = array<i64: 128, 64>}, {pipeline_mode = #tpu.pipeline_mode<synchronous>, transform_indices = @transform_2, window_bounds = array<i64: 1, 64>}, {pipeline_mode = #tpu.pipeline_mode<synchronous>, transform_indices = @transform_3, window_bounds = array<i64: 64, 128>}, {pipeline_mode = #tpu.pipeline_mode<synchronous>, transform_indices = @transform_4, window_bounds = array<i64: 1, 128>}, {transform_indices = @transform_5, window_bounds = array<i64: 8, 128>}]} {
    %c0 = arith.constant 0 : index
    %c0_0 = arith.constant 0 : index
    %0 = vector.load %arg1[%c0, %c0_0] : memref<8x128xf32, #tpu.memory_space<vmem>>, vector<8x128xf32>
    %1 = arith.truncf %0 : vector<8x128xf32> to vector<8x128xbf16>
    %c0_1 = arith.constant 0 : index
    %c0_2 = arith.constant 0 : index
    %2 = vector.load %arg2[%c0_1, %c0_2] : memref<128x64xbf16, #tpu.memory_space<vmem>>, vector<128x64xbf16>
    %cst = arith.constant dense<0.000000e+00> : vector<8x64xf32>
    %3 = tpu.matmul %1, %2, %cst {dimension_numbers = #tpu.dot_dimension_numbers<[1], [0], [0], [1], [0, 0, 1, 1], [], []>} : vector<8x128xbf16>, vector<128x64xbf16>, vector<8x64xf32> -> vector<8x64xf32>
    %c0_3 = arith.constant 0 : index
    %c0_4 = arith.constant 0 : index
    %4 = vector.load %arg3[%c0_3, %c0_4] : memref<1x64xf32, #tpu.memory_space<vmem>>, vector<1x64xf32>
    %5 = vector.broadcast %4 : vector<1x64xf32> to vector<8x64xf32>
    %6 = arith.addf %3, %5 : vector<8x64xf32>
    %7 = math.tanh %6 : vector<8x64xf32>
    %8 = arith.truncf %7 : vector<8x64xf32> to vector<8x64xbf16>
    %c0_5 = arith.constant 0 : index
    %c0_6 = arith.constant 0 : index
    %9 = vector.load %arg4[%c0_5, %c0_6] : memref<64x128xbf16, #tpu.memory_space<vmem>>, vector<64x128xbf16>
    %cst_7 = arith.constant dense<0.000000e+00> : vector<8x128xf32>
    %10 = tpu.matmul %8, %9, %cst_7 {dimension_numbers = #tpu.dot_dimension_numbers<[1], [0], [0], [1], [0, 0, 1, 1], [], []>} : vector<8x64xbf16>, vector<64x128xbf16>, vector<8x128xf32> -> vector<8x128xf32>
    %c0_8 = arith.constant 0 : index
    %c0_9 = arith.constant 0 : index
    %11 = vector.load %arg5[%c0_8, %c0_9] : memref<1x128xf32, #tpu.memory_space<vmem>>, vector<1x128xf32>
    %12 = vector.broadcast %11 : vector<1x128xf32> to vector<8x128xf32>
    %13 = arith.addf %10, %12 : vector<8x128xf32>
    %c0_10 = arith.constant 0 : index
    %c0_11 = arith.constant 0 : index
    %14 = vector.load %arg6[%c0_10, %c0_11] : memref<8x128xf32, #tpu.memory_space<vmem>>, vector<8x128xf32>
    tpu.vector_store %arg6[%c0_10, %c0_11], %13 {strides = array<i32>} : memref<8x128xf32, #tpu.memory_space<vmem>>, vector<8x128xf32>,
    return
  }
  func.func @transform_0(%arg0: i32) -> (i32, i32) {
    %c0_i32 = arith.constant 0 : i32
    %c0_i32_0 = arith.constant 0 : i32
    return %arg0, %c0_i32 : i32, i32
  }
  func.func @transform_1(%arg0: i32) -> (i32, i32) {
    %c0_i32 = arith.constant 0 : i32
    %c0_i32_0 = arith.constant 0 : i32
    %c0_i32_1 = arith.constant 0 : i32
    return %c0_i32, %c0_i32_0 : i32, i32
  }
  func.func @transform_2(%arg0: i32) -> (i32, i32) {
    %c0_i32 = arith.constant 0 : i32
    %c0_i32_0 = arith.constant 0 : i32
    %c0_i32_1 = arith.constant 0 : i32
    return %c0_i32, %c0_i32_0 : i32, i32
  }
  func.func @transform_3(%arg0: i32) -> (i32, i32) {
    %c0_i32 = arith.constant 0 : i32
    %c0_i32_0 = arith.constant 0 : i32
    %c0_i32_1 = arith.constant 0 : i32
    return %c0_i32, %c0_i32_0 : i32, i32
  }
  func.func @transform_4(%arg0: i32) -> (i32, i32) {
    %c0_i32 = arith.constant 0 : i32
    %c0_i32_0 = arith.constant 0 : i32
    %c0_i32_1 = arith.constant 0 : i32
    return %c0_i32, %c0_i32_0 : i32, i32
  }
  func.func @transform_5(%arg0: i32) -> (i32, i32) {
    %c0_i32 = arith.constant 0 : i32
    %c0_i32_0 = arith.constant 0 : i32
    return %arg0, %c0_i32 : i32, i32
  }
}

</mosaic_0001>

<bundles_post_ra>
// kernel: tpu_custom_call.1
= control target key start
LH: loop header
LB: loop body
LE: loop exit
PB: predicated region body
PF: predicated region fallthrough
CT: control target
= control target key end

     0   :  { %10 = vsyncpa [#allocation3], 0  ;;  %s1004_s0 = inlined_call_operand.hbm [shape: f32[16,1024], index: 0, kind: input, shape index: {}]   ;;  %s1005_s1 = inlined_call_operand.vmem [shape: bf16[128,64], index: 1, kind: input, shape index: {}]   ;;  %s1006_s2 = inlined_call_operand.vmem [shape: f32[1,64], index: 2, kind: input, shape index: {}]   ;;  %s1007_s3 = inlined_call_operand.vmem [shape: bf16[64,128], index: 3, kind: input, shape index: {}]   ;;  %s1008_s4 = inlined_call_operand.vmem [shape: f32[1,128], index: 4, kind: input, shape index: {}]   ;;  %s1009_s5 = inlined_call_operand.hbm [shape: f32[16,128], index: 5, kind: output, shape index: {}]  }
   0x1   :  { %12 = vsyncpa [#allocation3 + $0x1], 0 }
   0x2   :  { %13 = vsyncpa [#allocation4], 0 }
   0x3   :  { %15 = vsyncpa [#allocation4 + $0x1], 0  ;;  %s794_s18 = smov 0   ;;  %s796_s19 = smov 0  }
   0x4   :  { %s798_s20 = smov 0   ;;  %s800_s21 = smov 0  }
   0x5 LB: > { %s815_s22 = sadd.s32 4294967295, %s758_s21   ;;  %s525_s23 = sadd.s32 4294967294, %s758_s21   ;;  %s758_s21 = sphi %s800_s21, %s1024_s21   ;;  %s754_s20 = sphi %s798_s20, %s1023_s20   ;;  %s750_s19 = sphi %s796_s19, %s1022_s19   ;;  %s746_s18 = sphi %s794_s18, %s1021_s18  }
   0x6   : > { %s819_s24 = sadd.s32 1, %s758_s21   ;;  %s28_s25 = sadd.s32 1, %s754_s20 }
   0x7   : > { %s25_s26 = ssub.s32 %s758_s21, %s819_s24  ;;  %p35_p0 = scmp.ne.s32.totalorder %s754_s20, %s750_s19 }
   0x8   : > { %p26_p1 = scmp.eq.s32.totalorder %s25_s26, 0  ;;  %p36_p2 = scmp.eq.s32.totalorder %s758_s21, 0 }
   0x9   : > { %p41_p3 = scmp.ne.s32.totalorder %s750_s19, %s746_s18  ;;  %p42_p4 = scmp.eq.s32.totalorder %s815_s22, 0 }
   0xa   : > { %s831_s27 = scalar_select %p26_p1, %s754_s20, %s28_s25  }
   0xb   : > { %p833_p5 = por %p36_p2, %p35_p0  ;;  %p837_p6 = por %p42_p4, %p41_p3 }
   0xc   : > { %p149_p7 = scmp.eq.s32.totalorder %s815_s22, 1  ;;  %p155_p8 = scmp.eq.s32.totalorder %s525_s23, 1 }
   0xd   : > { %p612_p10 = scmp.lt.s32.totalorder %s758_s21, 2  ;;  %s187_s7 = sand.u32 1, %s754_s20  }
   0xe   : > { %p844_p11 = por %p149_p7, %p35_p0  ;;  %p848_p12 = por %p155_p8, %p41_p3 }
   0xf   : > { %s553_s8 = sshll.u32 %s758_s21, 10  ;;  %s528_s9 = sshll.u32 %s187_s7, 3 }
  0x10   : > { %s1013_s30 = scalar_select %p844_p11, 1, 0 }
  0x11   : > { %s1014_s6 = scalar_select %p848_p12, 1, 0 }
  0x12   : > { %s857_s12 = scalar_lea.hbm %s1004_s0, %s553_s8  ;;  %s191_s13 = scalar_lea.vmem [#allocation2], %s528_s9 }
  0x13   : > { %s199_s14 = sshll.u32 %s191_s13, 4  ;;  %p861_p13 = pnand %p612_p10, %p833_p5  ;;  %s865_s14 = int_to_ptr.vmem [resolvable:$true] %s199_s14 }
  0x14   : > { %s188_s16 = scalar_lea.sflag [#allocation3], %s187_s7  ;;  %s662_s17 = scalar_lea.hbm %s857_s12, 128 }
  0x15   : > { %p663_p2 = scmp.ne.s32.totalorder %s857_s12, %s662_s17  ;;  %p664_p3 = pneg %p861_p13 }
  0x16   : > { %s667_s26 = scalar_lea.hbm %s1004_s0, 2048  ;;  %p668_p5 = scmp.lt.u32.totalorder %s857_s12, %s1004_s0 }
  0x17   : > { %p665_p4 = pnand %p664_p3, %p663_p2  ;;  %p669_p8 = scmp.lt.u32.totalorder %s667_s26, %s662_s17 }
  0x18   : > { %p671_p9 = scmp.lt.u32.totalorder %s662_s17, %s857_s12 }
  0x19   : > { %p666_p7 = pneg %p665_p4  ;;  %p670_p10 = por %p669_p8, %p668_p5 }
  0x1b   : > { %p672_p0 = por %p671_p9, %p670_p10 }
  0x1d   : > { %p673_p1 = pnand %p672_p0, %p666_p7 }
  0x1f   : > { %676 = shalt.err (!%p673_p1)
}
  0x20   : > { %s677_s7 = scalar_lea.vmem %s865_s14, 128  ;;  %s760_s9 = smov [#allocation2]  }
  0x21   : > { %p678_p2 = scmp.ne.s32.totalorder %s865_s14, %s677_s7  ;;  %s682_s10 = sshll.u32 %s760_s9, 4  ;;  %s683_s10 = int_to_ptr.vmem [resolvable:$false] %s682_s10 }
  0x22   : > { %s684_s11 = scalar_lea.vmem %s683_s10, 256  ;;  %p685_p11 = scmp.lt.s32.totalorder %s865_s14, %s683_s10 }
  0x23   : > { %p680_p4 = pnand %p678_p2, %p664_p3  ;;  %p686_p5 = scmp.lt.s32.totalorder %s684_s11, %s677_s7 }
  0x25   : > { %p681_p12 = pneg %p680_p4  ;;  %p687_p8 = por %p686_p5, %p685_p11 }
  0x27   : > { %p688_p9 = pnand %p687_p8, %p681_p12 }
  0x29   : > { %691 = shalt.err (!%p688_p9)
}
  0x2a   : > { %607 = dma.hbm_to_vmem [thread:$0]  (!%p861_p13), %s857_s12, 128, %s865_s14, %s188_s16  }
  0x2b   : > { %p1016_p0 = scmp.lt.s32.totalorder %s758_s21, 3  ;;  %p1017_p1 = scmp.ge.s32.totalorder %s758_s21, 1 }
  0x2d   : > { %p205_p3 = pnand %p1017_p1, %p1016_p0 }
  0x2e   : > { %s899_s13 = sand.u32 (!%p205_p3), 1, %s750_s19  }
  0x2f   : > { %208 = sbr.rel (%p205_p3) target bundleno = 544 (0x220), region = 40  ;;  %s532_s17 = sshll.u32 (!%p205_p3), %s899_s13, 3 }
  0x30   : > { %s211_s23 = scalar_lea.sflag (!%p205_p3), [#allocation3], %s899_s13  ;;  %s905_s15 = scalar_lea.vmem (!%p205_p3), [#allocation2], %s532_s17 }
  0x36   : > { %737 = dma.done.wait (%p837_p6), %s211_s23, 128  }
  0x37   : > { %739 = vsyncadd (%p837_p6), %s211_s23, 4294967168  ;;  %v761_v0 = vmov 0.0   ;;  %vm762_vm0 = vmmov 0   ;;  %v648_v1 = vld [vmem:[%s1005_s1] sm:$0xff]   ;;  %v649_v2 = vld [vmem:[%s1005_s1 + $0x8] sm:$0xff]   ;;  %vm396_vm1 = vcmask 523264  }
  0x38   : > { %568 = vmatprep.subr.bf16.mxu0 %v761_v0  ;;  %584 = vmatprep.mubr.msk.bf16.mxu0 %vm762_vm0, %v761_v0  ;;  %v650_v3 = vld [vmem:[%s1005_s1 + $0x10] sm:$0xff]   ;;  %v651_v4 = vld [vmem:[%s1005_s1 + $0x18] sm:$0xff]   ;;  %v652_v5 = vld [vmem:[%s1005_s1 + $0x20] sm:$0xff]   ;;  %s550_s14 = sshll.u32 %s815_s22, 7  ;;  %s240_s16 = scalar_lea.vmem [#allocation5], %s532_s17 }
  0x39   : > { %588 = vmatprep.subr.bf16.mxu1 %v761_v0  ;;  %596 = vmatprep.mubr.msk.bf16.mxu1 %vm762_vm0, %v761_v0  ;;  %v653_v6 = vld [vmem:[%s1005_s1 + $0x28] sm:$0xff]   ;;  %v654_v7 = vld [vmem:[%s1005_s1 + $0x30] sm:$0xff]   ;;  %v655_v8 = vld [vmem:[%s1005_s1 + $0x38] sm:$0xff]   ;;  %s455_s25 = sshll.u32 %s240_s16, 4  ;;  %s960_s28 = scalar_lea.hbm %s1009_s5, %s550_s14  ;;  %s962_s25 = int_to_ptr.vmem [resolvable:$true] %s455_s25 }
  0x3a   : > { %569 = vmatpush3.bf16.msra.mxu0 %v648_v1  ;;  %v242_v9 = vld [vmem:[%s905_s15] sm:$0xff]  ;;  %v658_v13 = vld [vmem:[%s1007_s3 + $0x10] sm:$0xff]   ;;  %v659_v14 = vld [vmem:[%s1007_s3 + $0x18] sm:$0xff]   ;;  %s442_s22 = scalar_lea.sflag [#allocation4], %s899_s13  ;;  %s692_s8 = scalar_lea.vmem %s962_s25, 128 }
  0x3b   : > { %570 = vmatprep.subr.bf16.mxu0 %v761_v0  ;;  %v243_v10 = vpack.c.bf16 %v242_v9, %v242_v9  ;;  %v656_v11 = vld [vmem:[%s1007_s3] sm:$0xff]   ;;  %v657_v12 = vld [vmem:[%s1007_s3 + $0x8] sm:$0xff]   ;;  %p693_p6 = scmp.ne.s32.totalorder %s962_s25, %s692_s8  ;;  %p1018_p11 = scmp.ne.s32.totalorder %s1013_s30, 0 }
  0x3c   : > { %589 = vmatpush3.bf16.msra.mxu1 %v656_v11  ;;  %v534_v15 = vld [vmem:[%s1006_s2] ss:$0 sm:$0xff]  ;;  %s763_s17 = smov [#allocation5]  }
  0x3d   : > { %590 = vmatprep.subr.bf16.mxu1 %v761_v0  ;;  %v543_v23 = vld [vmem:[%s1008_s4] ss:$0 sm:$0xff]  ;;  %p694_p12 = pnand %p693_p6, %p1018_p11  ;;  %s696_s7 = sshll.u32 %s763_s17, 4  ;;  %s697_s7 = int_to_ptr.vmem [resolvable:$false] %s696_s7 }
  0x3e   : > { %571 = vmatpush3.bf16.msra.mxu0 %v649_v2  ;;  %s698_s15 = scalar_lea.vmem %s697_s7, 256  ;;  %p699_p7 = scmp.lt.s32.totalorder %s962_s25, %s697_s7 }
  0x3f   : > { %572 = vmatprep.subr.bf16.mxu0 %v761_v0  ;;  %p695_p13 = pneg %p694_p12  ;;  %p700_p10 = scmp.lt.s32.totalorder %s698_s15, %s692_s8 }
  0x40   : > { %591 = vmatpush3.bf16.msra.mxu1 %v657_v12 }
  0x41   : > { %592 = vmatprep.subr.bf16.mxu1 %v761_v0  ;;  %p701_p2 = por %p700_p10, %p699_p7 }
  0x42   : > { %573 = vmatpush3.bf16.msra.mxu0 %v650_v3 }
  0x43   : > { %574 = vmatprep.subr.bf16.mxu0 %v761_v0  ;;  %p702_p4 = pnand %p701_p2, %p695_p13 }
  0x44   : > { %593 = vmatpush3.bf16.msra.mxu1 %v658_v13 }
  0x45   : > { %594 = vmatprep.subr.bf16.mxu1 %v761_v0 }
  0x46   : > { %575 = vmatpush3.bf16.msra.mxu0 %v651_v4 }
  0x47   : > { %576 = vmatprep.subr.bf16.mxu0 %v761_v0 }
  0x48   : > { %595 = vmatpush3.bf16.msra.mxu1 %v659_v14 }
  0x4a   : > { %577 = vmatpush3.bf16.msra.mxu0 %v652_v5 }
  0x4b   : > { %578 = vmatprep.subr.bf16.mxu0 %v761_v0 }
  0x4e   : > { %579 = vmatpush3.bf16.msra.mxu0 %v653_v6 }
  0x4f   : > { %580 = vmatprep.subr.bf16.mxu0 %v761_v0 }
  0x52   : > { %581 = vmatpush3.bf16.msra.mxu0 %v654_v7 }
  0x53   : > { %582 = vmatprep.subr.bf16.mxu0 %v761_v0 }
  0x56   : > { %583 = vmatpush3.bf16.msra.mxu0 %v655_v8 }
  0x59   : > { %585 = vmatmul.mubr.bf16.vlgmr.msra.gmra.mrb[0].mxu0 %v243_v10 }
 0x12c   : > { %v349_v16 = vpop.f32.mrb[0].mxu0 }
 0x12d   : > { %v350_v17 = vadd.f32 %v534_v15, %v349_v16  ;;  %v586_v18 = vpop.f32.mrb[1].mxu0 }
 0x12e   : > { %v352_v19 = vpop.f32.mrb[2].mxu0 }
 0x12f   : > { %660 = vtanh.f32 %v350_v17  ;;  %v587_v20 = vpop.f32.mrb[3].mxu0 }
 0x139   : > { %v661_v21 = vpop.eup %660 }
 0x13a   : > { %v356_v22 = vpack.c.bf16 %v661_v21, %v661_v21 }
 0x13c   : > { %597 = vmatmul.mubr.msk.bf16.vlgmr.msra.gmra.mrb[0].mxu1 %vm396_vm1, %v356_v22 }
 0x20f   : > { %v434_v24 = vpop.f32.mrb[0].mxu1 }
 0x210   : > { %v435_v25 = vadd.f32 %v543_v23, %v434_v24  ;;  %v598_v26 = vpop.f32.mrb[1].mxu1 }
 0x211   : > { %v437_v27 = vpop.f32.mrb[2].mxu1 }
 0x212   : > { %440 = vst [vmem:[%s240_s16] sm:$0xff] %v435_v25  ;;  %v599_v28 = vpop.f32.mrb[3].mxu1 }
 0x213   : > { %705 = shalt.err (!%p702_p4)
}
 0x214   : > { %s706_s13 = scalar_lea.hbm %s960_s28, 128  ;;  %s710_s11 = scalar_lea.hbm %s1009_s5, 256 }
 0x215   : > { %p707_p5 = scmp.ne.s32.totalorder %s960_s28, %s706_s13  ;;  %p711_p0 = scmp.lt.u32.totalorder %s960_s28, %s1009_s5 }
 0x216   : > { %p712_p1 = scmp.lt.u32.totalorder %s710_s11, %s706_s13  ;;  %p714_p6 = scmp.lt.u32.totalorder %s706_s13, %s960_s28 }
 0x217   : > { %p708_p8 = pnand %p707_p5, %p1018_p11 }
 0x218   : > { %p713_p3 = por %p712_p1, %p711_p0 }
 0x219   : > { %p709_p9 = pneg %p708_p8 }
 0x21a   : > { %p715_p12 = por %p714_p6, %p713_p3 }
 0x21c   : > { %p716_p13 = pnand %p715_p12, %p709_p9 }
 0x21e   : > { %719 = shalt.err (!%p716_p13)
}
 0x21f   : > { %602 = dma.vmem_to_hbm [thread:$0]  (%p1018_p11), %s962_s25, 128, %s960_s28, %s442_s22  }
 0x220 PF: > { %s467_s14 = sand.u32 1, %s746_s18   ;;  %p1019_p7 = scmp.ne.s32.totalorder %s1014_s6, 0 }
 0x221   : > { %p1020_p10 = scmp.ge.s32.totalorder %s758_s21, 2  ;;  %s468_s16 = scalar_lea.sflag [#allocation4], %s467_s14 }
 0x223   : > { %p609_p2 = pnand %p1020_p10, %p1019_p7 }
 0x225   : > { %741 = dma.done.wait (!%p609_p2), %s468_s16, 128  }
 0x226   : > { %743 = vsyncadd (!%p609_p2), %s468_s16, 4294967168  ;;  %p18_p4 = scmp.ge.s32.totalorder %s819_s24, 4   ;;  %s1021_s18 = smov %s750_s19 }
 0x227   : > { %s1022_s19 = smov %s754_s20  ;;  %s1023_s20 = smov %s831_s27 }
 0x228   : > { %s1024_s21 = smov %s819_s24  ;;  %20 = sbr.rel (!%p18_p4) target bundleno = 5 (0x5), region = 85 }
 0x22f   :  { %473 = vsyncpa [#allocation3], 1 }
 0x230   :  { %475 = vsyncpa [#allocation3 + $0x1], 1 }
 0x231   :  { %476 = vsyncpa [#allocation4], 1 }
 0x232   :  { %478 = vsyncpa [#allocation4 + $0x1], 1 }

</bundles_post_ra>
